<compile_context>
chip_gen: v6e
topology: v6e:2x2x1
jax: 0.10.0
libtpu: 0.0.40
codegen_flags: <defaults>
</compile_context>

<pallas_src>
import functools

import jax
import jax.numpy as jnp
from jax.experimental import pallas as pl
from jax.experimental.pallas import tpu as pltpu

C = 16                       # GatedGraphConv out_channels
L = 2                        # GatedGraphConv num_layers
H_FC = 8                     # fc1 hidden width
P_DROP = 0.4
GATE_ROWS = 4 * C            # 64 fused gate rows per inner layer (r, z, gi_n, gh_n)
RHS_K = 2 * C + 8            # 40 = [hA ; h ; ones-block]
CONV_ROWS = L * GATE_ROWS    # 128 fused-weight rows per conv

# fused conv weight slab [2*CONV_ROWS, RHS_K] = [256, 40], per inner layer block:
#   rows  0:16  r-gate : [Wih_r @ W_l^T | Whh_r | (bih_r+bhh_r) | 0x7]
#   rows 16:32  z-gate : [Wih_z @ W_l^T | Whh_z | (bih_z+bhh_z) | 0x7]
#   rows 32:48  gi_n   : [Wih_n @ W_l^T |   0   |  bih_n        | 0x7]
#   rows 48:64  gh_n   : [      0       | Whh_n |  bhh_n        | 0x7]
# fc slab [2*H_FC+1, C] = [17, 16]:
#   rows 0:8 fc1.weight | rows 8:16 col0=fc1.bias col1=fc2.weight | row 16 col0=fc2.bias


def ggcn_kernel(x_ref, a_ref, g_ref, w_ref, fc_ref, dconv_ref, dfc_ref, out_ref):
    h = x_ref[...]                          # [C, N_g]
    a = a_ref[0]                            # [N_g, N_g]   (A^T block: a[src, dst])
    n_lanes = h.shape[1]
    ones_blk = jnp.ones((8, n_lanes), jnp.float32)

    def conv(h, base):
        for layer in range(L):
            w = w_ref[base + layer * GATE_ROWS:base + (layer + 1) * GATE_ROWS, :]
            # (1) aggregate h over edges (dense block-diagonal adjacency block)
            hA = jnp.dot(h, a, preferred_element_type=jnp.float32)        # [C, N_g]
            # (2) one fused gate matmul; biases come out of the MXU already added
            rhs = jnp.concatenate([hA, h, ones_blk], axis=0)              # [40, N_g]
            gates = jnp.dot(w, rhs, preferred_element_type=jnp.float32)   # [64, N_g]
            r = jax.nn.sigmoid(gates[0:C, :])
            z = jax.nn.sigmoid(gates[C:2 * C, :])
            n = jnp.tanh(gates[2 * C:3 * C, :] + r * gates[3 * C:4 * C, :])
            h = (1.0 - z) * n + z * h
        return h

    # conv1 -> relu -> dropout (mask pre-scaled by 1/(1-p) on the host)
    h = jnp.maximum(conv(h, 0), 0.0)
    h = h * dconv_ref[...]
    # conv2 -> relu
    h = jnp.maximum(conv(h, CONV_ROWS), 0.0)

    # gather this group's gene nodes: one-hot matmul [C, N_g] @ [N_g, B_g]
    t = jnp.dot(h, g_ref[0], preferred_element_type=jnp.float32)          # [C, B_g]

    # fc1 -> relu -> dropout (mask pre-scaled)
    fc1w = fc_ref[0:H_FC, :]                                              # [8, 16]
    fc1b = fc_ref[H_FC:2 * H_FC, 0:1]                                     # [8, 1]
    u = jnp.maximum(jnp.dot(fc1w, t, preferred_element_type=jnp.float32) + fc1b, 0.0)
    u = u * dfc_ref[0]                                                    # [8, B_g]

    # fc2 as broadcast-multiply + sublane reduction (avoids a padded MXU op)
    fc2w = fc_ref[H_FC:2 * H_FC, 1:2]                                     # [8, 1]
    fc2b = fc_ref[2 * H_FC:2 * H_FC + 1, 0:1]                             # [1, 1]
    out_ref[0] = jnp.sum(fc2w * u, axis=0, keepdims=True) + fc2b          # [1, B_g]


def ggcn_forward(x_t, adj_blocks, gather_blocks, conv_w, fc_slab, drop_conv, drop_fc):
    """x_t: [C, N]; adj_blocks: [G, N_g, N_g]; gather_blocks: [G, N_g, B_g]."""
    n_groups, n_g, b_g = gather_blocks.shape
    out = pl.pallas_call(
        ggcn_kernel,
        out_shape=jax.ShapeDtypeStruct((n_groups, 1, b_g), jnp.float32),
        grid_spec=pltpu.PrefetchScalarGridSpec(
            num_scalar_prefetch=0,
            grid=(n_groups,),
            in_specs=[
                pl.BlockSpec((C, n_g), lambda g: (0, g)),            # x (transposed)
                pl.BlockSpec((1, n_g, n_g), lambda g: (g, 0, 0)),    # A^T blocks
                pl.BlockSpec((1, n_g, b_g), lambda g: (g, 0, 0)),    # one-hot gather
                pl.BlockSpec(conv_w.shape, lambda g: (0, 0)),        # fused conv weights
                pl.BlockSpec(fc_slab.shape, lambda g: (0, 0)),       # fc params
                pl.BlockSpec((C, n_g), lambda g: (0, g)),            # conv dropout mask
                pl.BlockSpec((1, H_FC, b_g), lambda g: (g, 0, 0)),   # fc dropout mask
            ],
            out_specs=pl.BlockSpec((1, 1, b_g), lambda g: (g, 0, 0)),
        ),
        compiler_params=pltpu.CompilerParams(dimension_semantics=("parallel",)),
    )(x_t, adj_blocks, gather_blocks, conv_w, fc_slab, drop_conv, drop_fc)
    return out.reshape(n_groups * b_g, 1)


# ---------------- pure-JAX reference (standard [N, C] layout) ----------------
def ref_forward(x, adj, rows, conv1, conv2, fc1w, fc1b, fc2w, fc2b, drop1, drop2):
    mm = functools.partial(jnp.dot, precision=jax.lax.Precision.HIGHEST)

    def gru(m, h, Wih, Whh, bih, bhh):
        gi = mm(m, Wih.T) + bih
        gh = mm(h, Whh.T) + bhh
        r = jax.nn.sigmoid(gi[:, 0:C] + gh[:, 0:C])
        z = jax.nn.sigmoid(gi[:, C:2 * C] + gh[:, C:2 * C])
        n = jnp.tanh(gi[:, 2 * C:3 * C] + r * gh[:, 2 * C:3 * C])
        return (1.0 - z) * n + z * h

    def conv(h, params):
        W, Wih, Whh, bih, bhh = params
        for _l in range(L):
            m = mm(h, W[_l])
            agg = mm(adj, m)              # scatter_add over edges
            h = gru(agg, h, Wih, Whh, bih, bhh)
        return h

    h = jnp.maximum(conv(x, conv1), 0.0)
    h = h * drop1 * (1.0 / (1.0 - P_DROP))
    h = jnp.maximum(conv(h, conv2), 0.0)
    t = h[rows]                                      # [B, C] gene-node gather
    t = jnp.maximum(mm(t, fc1w.T) + fc1b, 0.0)       # [B, 8]
    t = t * drop2 * (1.0 / (1.0 - P_DROP))
    return mm(t, fc2w.T) + fc2b                      # [B, 1]


if __name__ == "__main__":
    key = jax.random.PRNGKey(0)
    (k_x, k_c1, k_c2, k_fc1w, k_fc1b, k_fc2w, k_fc2b,
     k_d1, k_d2) = jax.random.split(key, 9)

    num_graphs = 16            # batch of graphs (= y.size(0))
    nodes_per_graph = 16
    N = num_graphs * nodes_per_graph      # 256 nodes total
    num_groups = 2                        # grid: 2 independent graph groups ("parallel")
    graphs_per_group = num_graphs // num_groups
    n_g = N // num_groups                 # 128 nodes (lanes) per grid step
    d_in = 4                   # raw node feature dim (< 16, zero-padded)
    gene_idx0 = 3              # graph.gene_idx_[0]

    # node features, zero-padded to out_channels=16 (GatedGraphConv semantics)
    x_raw = jax.random.normal(k_x, (N, d_in), jnp.float32)
    x = jnp.concatenate([x_raw, jnp.zeros((N, C - d_in), jnp.float32)], axis=1)

    # deterministic edge_index: bidirectional ring inside each graph
    src, dst = [], []
    for gidx in range(num_graphs):
        base = gidx * nodes_per_graph
        for i in range(nodes_per_graph):
            j = (i + 1) % nodes_per_graph
            src += [base + i, base + j]
            dst += [base + j, base + i]
    src = jnp.asarray(src, jnp.int32)
    dst = jnp.asarray(dst, jnp.int32)
    adj = jnp.zeros((N, N), jnp.float32).at[dst, src].add(1.0)    # A[dst, src]

    # gene-node row indices and their one-hot gather matrix (kernel uses [N, B])
    rows = gene_idx0 + jnp.arange(num_graphs) * nodes_per_graph
    gather_t = jax.nn.one_hot(rows, N, dtype=jnp.float32).T       # [N, B]

    # parameters (torch orientation)
    def init_conv(k):
        k1, k2, k3, k4, k5 = jax.random.split(k, 5)
        W = jax.random.normal(k1, (L, C, C), jnp.float32) * 0.1      # message weights
        Wih = jax.random.normal(k2, (3 * C, C), jnp.float32) * 0.1   # GRUCell weight_ih
        Whh = jax.random.normal(k3, (3 * C, C), jnp.float32) * 0.1   # GRUCell weight_hh
        bih = jax.random.normal(k4, (3 * C,), jnp.float32) * 0.1
        bhh = jax.random.normal(k5, (3 * C,), jnp.float32) * 0.1
        return W, Wih, Whh, bih, bhh

    W1, Wih1, Whh1, bih1, bhh1 = init_conv(k_c1)
    W2, Wih2, Whh2, bih2, bhh2 = init_conv(k_c2)
    fc1w = jax.random.normal(k_fc1w, (H_FC, C), jnp.float32) * 0.1   # [8, 16]
    fc1b = jax.random.normal(k_fc1b, (H_FC,), jnp.float32) * 0.1
    fc2w = jax.random.normal(k_fc2w, (1, H_FC), jnp.float32) * 0.1   # [1, 8]
    fc2b = jax.random.normal(k_fc2b, (1,), jnp.float32) * 0.1

    # F.dropout(p=0.4) runs with training=True in the reference module; use
    # deterministic precomputed keep-masks (inverted dropout applied in-kernel).
    # TODO(synk): cannot reproduce PyTorch's dropout RNG stream bit-exactly.
    drop1 = jax.random.bernoulli(k_d1, 1.0 - P_DROP, (N, C)).astype(jnp.float32)
    drop2 = jax.random.bernoulli(k_d2, 1.0 - P_DROP, (num_graphs, H_FC)).astype(jnp.float32)

    # ---- host-side packing into the kernel's fused / transposed layout ----
    def pack_conv(W, Wih, Whh, bih, bhh):
        blocks = []
        z_cc = jnp.zeros((C, C), jnp.float32)
        z_pad = jnp.zeros((C, 7), jnp.float32)
        col = lambda v: v.reshape(C, 1)
        for l in range(L):
            M = jnp.dot(Wih, W[l].T, precision=jax.lax.Precision.HIGHEST)   # [3C, C]
            r_rows = jnp.concatenate(
                [M[0:C], Whh[0:C], col(bih[0:C] + bhh[0:C]), z_pad], axis=1)
            z_rows = jnp.concatenate(
                [M[C:2 * C], Whh[C:2 * C], col(bih[C:2 * C] + bhh[C:2 * C]), z_pad], axis=1)
            gin_rows = jnp.concatenate(
                [M[2 * C:3 * C], z_cc, col(bih[2 * C:3 * C]), z_pad], axis=1)
            ghn_rows = jnp.concatenate(
                [z_cc, Whh[2 * C:3 * C], col(bhh[2 * C:3 * C]), z_pad], axis=1)
            blocks.append(jnp.concatenate([r_rows, z_rows, gin_rows, ghn_rows], axis=0))
        return jnp.concatenate(blocks, axis=0)                        # [128, 40]

    conv_w = jnp.concatenate([pack_conv(W1, Wih1, Whh1, bih1, bhh1),
                              pack_conv(W2, Wih2, Whh2, bih2, bhh2)], axis=0)   # [256, 40]

    fc_extra = jnp.zeros((H_FC + 1, C), jnp.float32)
    fc_extra = fc_extra.at[0:H_FC, 0].set(fc1b)
    fc_extra = fc_extra.at[0:H_FC, 1].set(fc2w.reshape(-1))
    fc_extra = fc_extra.at[H_FC, 0].set(fc2b[0])
    fc_slab = jnp.concatenate([fc1w, fc_extra], axis=0)               # [17, 16]

    inv_keep = 1.0 / (1.0 - P_DROP)                   # fold 1/(1-p) into the masks
    drop_conv = drop1.T * inv_keep                                    # [C, N]
    drop_fc = (drop2 * inv_keep).reshape(num_groups, graphs_per_group, H_FC)
    drop_fc = jnp.transpose(drop_fc, (0, 2, 1))                       # [G, H_FC, B_g]

    # block-diagonal adjacency / gather blocks (graphs are disjoint across groups)
    adj_t = adj.T
    adj_blocks = jnp.stack(
        [adj_t[g * n_g:(g + 1) * n_g, g * n_g:(g + 1) * n_g]
         for g in range(num_groups)])                                 # [G, N_g, N_g]
    gather_blocks = jnp.stack(
        [gather_t[g * n_g:(g + 1) * n_g,
                  g * graphs_per_group:(g + 1) * graphs_per_group]
         for g in range(num_groups)])                                 # [G, N_g, B_g]

    out = ggcn_forward(x.T, adj_blocks, gather_blocks, conv_w, fc_slab,
                       drop_conv, drop_fc)
    out = jax.block_until_ready(out)

    ref = jax.block_until_ready(
        ref_forward(x, adj, rows,
                    (W1, Wih1, Whh1, bih1, bhh1),
                    (W2, Wih2, Whh2, bih2, bhh2),
                    fc1w, fc1b, fc2w, fc2b, drop1, drop2))

    assert out.shape == (num_graphs, 1), out.shape
    assert jnp.allclose(out, ref, atol=1e-3, rtol=1e-3), (out, ref)

    print("KERNEL_OK")
</pallas_src>

<mosaic_0001>
module attributes {stable_mosaic.version = 11 : i64} {
  func.func @ggcn_kernel(%arg0: i32, %arg1: memref<16x128xf32, #tpu.memory_space<vmem>>, %arg2: memref<1x128x128xf32, #tpu.memory_space<vmem>>, %arg3: memref<1x128x8xf32, #tpu.memory_space<vmem>>, %arg4: memref<256x40xf32, #tpu.memory_space<vmem>>, %arg5: memref<17x16xf32, #tpu.memory_space<vmem>>, %arg6: memref<16x128xf32, #tpu.memory_space<vmem>>, %arg7: memref<1x8x8xf32, #tpu.memory_space<vmem>>, %arg8: memref<1x1x8xf32, #tpu.memory_space<vmem>>) attributes {dimension_semantics = [#tpu.dimension_semantics<parallel>], iteration_bounds = array<i64: 2>, scalar_prefetch = 0 : i64, scratch_operands = 0 : i64, tpu.core_type = #tpu.core_type<tc>, window_params = [{transform_indices = @transform_0, window_bounds = array<i64: 16, 128>}, {transform_indices = @transform_1, window_bounds = array<i64: 1, 128, 128>}, {transform_indices = @transform_2, window_bounds = array<i64: 1, 128, 8>}, {pipeline_mode = #tpu.pipeline_mode<synchronous>, transform_indices = @transform_3, window_bounds = array<i64: 256, 40>}, {pipeline_mode = #tpu.pipeline_mode<synchronous>, transform_indices = @transform_4, window_bounds = array<i64: 17, 16>}, {transform_indices = @transform_5, window_bounds = array<i64: 16, 128>}, {transform_indices = @transform_6, window_bounds = array<i64: 1, 8, 8>}, {transform_indices = @transform_7, window_bounds = array<i64: 1, 1, 8>}]} {
    %c0 = arith.constant 0 : index
    %c0_0 = arith.constant 0 : index
    %0 = vector.load %arg1[%c0, %c0_0] : memref<16x128xf32, #tpu.memory_space<vmem>>, vector<16x128xf32>
    %c0_1 = arith.constant 0 : index
    %c0_2 = arith.constant 0 : index
    %c0_3 = arith.constant 0 : index
    %1 = vector.load %arg2[%c0_1, %c0_2, %c0_3] : memref<1x128x128xf32, #tpu.memory_space<vmem>>, vector<1x128x128xf32>
    %2 = vector.shape_cast %1 : vector<1x128x128xf32> to vector<128x128xf32>
    %cst = arith.constant 1.000000e+00 : f32
    %3 = vector.broadcast %cst : f32 to vector<8x128xf32>
    %c0_4 = arith.constant 0 : index
    %c0_5 = arith.constant 0 : index
    %4 = vector.load %arg4[%c0_4, %c0_5] : memref<256x40xf32, #tpu.memory_space<vmem>>, vector<64x40xf32>
    %cst_6 = arith.constant dense<0.000000e+00> : vector<16x128xf32>
    %5 = tpu.matmul %0, %2, %cst_6 {dimension_numbers = #tpu.dot_dimension_numbers<[1], [0], [0], [1], [0, 0, 1, 1], [], []>} : vector<16x128xf32>, vector<128x128xf32>, vector<16x128xf32> -> vector<16x128xf32>
    %6 = tpu.concatenate %5, %0, %3 in 0 : vector<16x128xf32>, vector<16x128xf32>, vector<8x128xf32> -> vector<40x128xf32>
    %cst_7 = arith.constant dense<0.000000e+00> : vector<64x128xf32>
    %7 = tpu.matmul %4, %6, %cst_7 {dimension_numbers = #tpu.dot_dimension_numbers<[1], [0], [0], [1], [0, 0, 1, 1], [], []>} : vector<64x40xf32>, vector<40x128xf32>, vector<64x128xf32> -> vector<64x128xf32>
    %8 = vector.extract_strided_slice %7 {offsets = [0, 0], sizes = [16, 128], strides = [1, 1]} : vector<64x128xf32> to vector<16x128xf32>
    %9 = arith.negf %8 : vector<16x128xf32>
    %10 = math.exp %9 : vector<16x128xf32>
    %cst_8 = arith.constant 1.000000e+00 : f32
    %11 = vector.broadcast %cst_8 : f32 to vector<16x128xf32>
    %12 = arith.addf %11, %10 : vector<16x128xf32>
    %13 = arith.divf %11, %12 : vector<16x128xf32>
    %14 = vector.extract_strided_slice %7 {offsets = [16, 0], sizes = [16, 128], strides = [1, 1]} : vector<64x128xf32> to vector<16x128xf32>
    %15 = arith.negf %14 : vector<16x128xf32>
    %16 = math.exp %15 : vector<16x128xf32>
    %cst_9 = arith.constant 1.000000e+00 : f32
    %17 = vector.broadcast %cst_9 : f32 to vector<16x128xf32>
    %18 = arith.addf %17, %16 : vector<16x128xf32>
    %19 = arith.divf %17, %18 : vector<16x128xf32>
    %20 = vector.extract_strided_slice %7 {offsets = [32, 0], sizes = [16, 128], strides = [1, 1]} : vector<64x128xf32> to vector<16x128xf32>
    %21 = vector.extract_strided_slice %7 {offsets = [48, 0], sizes = [16, 128], strides = [1, 1]} : vector<64x128xf32> to vector<16x128xf32>
    %22 = arith.mulf %13, %21 : vector<16x128xf32>
    %23 = arith.addf %20, %22 : vector<16x128xf32>
    %24 = math.tanh %23 : vector<16x128xf32>
    %cst_10 = arith.constant 1.000000e+00 : f32
    %25 = vector.broadcast %cst_10 : f32 to vector<16x128xf32>
    %26 = arith.subf %25, %19 : vector<16x128xf32>
    %27 = arith.mulf %26, %24 : vector<16x128xf32>
    %28 = arith.mulf %19, %0 : vector<16x128xf32>
    %29 = arith.addf %27, %28 : vector<16x128xf32>
    %c64 = arith.constant 64 : index
    %c0_11 = arith.constant 0 : index
    %30 = vector.load %arg4[%c64, %c0_11] : memref<256x40xf32, #tpu.memory_space<vmem>>, vector<64x40xf32>
    %cst_12 = arith.constant dense<0.000000e+00> : vector<16x128xf32>
    %31 = tpu.matmul %29, %2, %cst_12 {dimension_numbers = #tpu.dot_dimension_numbers<[1], [0], [0], [1], [0, 0, 1, 1], [], []>} : vector<16x128xf32>, vector<128x128xf32>, vector<16x128xf32> -> vector<16x128xf32>
    %32 = tpu.concatenate %31, %29, %3 in 0 : vector<16x128xf32>, vector<16x128xf32>, vector<8x128xf32> -> vector<40x128xf32>
    %cst_13 = arith.constant dense<0.000000e+00> : vector<64x128xf32>
    %33 = tpu.matmul %30, %32, %cst_13 {dimension_numbers = #tpu.dot_dimension_numbers<[1], [0], [0], [1], [0, 0, 1, 1], [], []>} : vector<64x40xf32>, vector<40x128xf32>, vector<64x128xf32> -> vector<64x128xf32>
    %34 = vector.extract_strided_slice %33 {offsets = [0, 0], sizes = [16, 128], strides = [1, 1]} : vector<64x128xf32> to vector<16x128xf32>
    %35 = arith.negf %34 : vector<16x128xf32>
    %36 = math.exp %35 : vector<16x128xf32>
    %cst_14 = arith.constant 1.000000e+00 : f32
    %37 = vector.broadcast %cst_14 : f32 to vector<16x128xf32>
    %38 = arith.addf %37, %36 : vector<16x128xf32>
    %39 = arith.divf %37, %38 : vector<16x128xf32>
    %40 = vector.extract_strided_slice %33 {offsets = [16, 0], sizes = [16, 128], strides = [1, 1]} : vector<64x128xf32> to vector<16x128xf32>
    %41 = arith.negf %40 : vector<16x128xf32>
    %42 = math.exp %41 : vector<16x128xf32>
    %cst_15 = arith.constant 1.000000e+00 : f32
    %43 = vector.broadcast %cst_15 : f32 to vector<16x128xf32>
    %44 = arith.addf %43, %42 : vector<16x128xf32>
    %45 = arith.divf %43, %44 : vector<16x128xf32>
    %46 = vector.extract_strided_slice %33 {offsets = [32, 0], sizes = [16, 128], strides = [1, 1]} : vector<64x128xf32> to vector<16x128xf32>
    %47 = vector.extract_strided_slice %33 {offsets = [48, 0], sizes = [16, 128], strides = [1, 1]} : vector<64x128xf32> to vector<16x128xf32>
    %48 = arith.mulf %39, %47 : vector<16x128xf32>
    %49 = arith.addf %46, %48 : vector<16x128xf32>
    %50 = math.tanh %49 : vector<16x128xf32>
    %cst_16 = arith.constant 1.000000e+00 : f32
    %51 = vector.broadcast %cst_16 : f32 to vector<16x128xf32>
    %52 = arith.subf %51, %45 : vector<16x128xf32>
    %53 = arith.mulf %52, %50 : vector<16x128xf32>
    %54 = arith.mulf %45, %29 : vector<16x128xf32>
    %55 = arith.addf %53, %54 : vector<16x128xf32>
    %cst_17 = arith.constant 0.000000e+00 : f32
    %56 = vector.broadcast %cst_17 : f32 to vector<16x128xf32>
    %57 = arith.maximumf %55, %56 : vector<16x128xf32>
    %c0_18 = arith.constant 0 : index
    %c0_19 = arith.constant 0 : index
    %58 = vector.load %arg6[%c0_18, %c0_19] : memref<16x128xf32, #tpu.memory_space<vmem>>, vector<16x128xf32>
    %59 = arith.mulf %57, %58 : vector<16x128xf32>
    %c128 = arith.constant 128 : index
    %c0_20 = arith.constant 0 : index
    %60 = vector.load %arg4[%c128, %c0_20] : memref<256x40xf32, #tpu.memory_space<vmem>>, vector<64x40xf32>
    %cst_21 = arith.constant dense<0.000000e+00> : vector<16x128xf32>
    %61 = tpu.matmul %59, %2, %cst_21 {dimension_numbers = #tpu.dot_dimension_numbers<[1], [0], [0], [1], [0, 0, 1, 1], [], []>} : vector<16x128xf32>, vector<128x128xf32>, vector<16x128xf32> -> vector<16x128xf32>
    %62 = tpu.concatenate %61, %59, %3 in 0 : vector<16x128xf32>, vector<16x128xf32>, vector<8x128xf32> -> vector<40x128xf32>
    %cst_22 = arith.constant dense<0.000000e+00> : vector<64x128xf32>
    %63 = tpu.matmul %60, %62, %cst_22 {dimension_numbers = #tpu.dot_dimension_numbers<[1], [0], [0], [1], [0, 0, 1, 1], [], []>} : vector<64x40xf32>, vector<40x128xf32>, vector<64x128xf32> -> vector<64x128xf32>
    %64 = vector.extract_strided_slice %63 {offsets = [0, 0], sizes = [16, 128], strides = [1, 1]} : vector<64x128xf32> to vector<16x128xf32>
    %65 = arith.negf %64 : vector<16x128xf32>
    %66 = math.exp %65 : vector<16x128xf32>
    %cst_23 = arith.constant 1.000000e+00 : f32
    %67 = vector.broadcast %cst_23 : f32 to vector<16x128xf32>
    %68 = arith.addf %67, %66 : vector<16x128xf32>
    %69 = arith.divf %67, %68 : vector<16x128xf32>
    %70 = vector.extract_strided_slice %63 {offsets = [16, 0], sizes = [16, 128], strides = [1, 1]} : vector<64x128xf32> to vector<16x128xf32>
    %71 = arith.negf %70 : vector<16x128xf32>
    %72 = math.exp %71 : vector<16x128xf32>
    %cst_24 = arith.constant 1.000000e+00 : f32
    %73 = vector.broadcast %cst_24 : f32 to vector<16x128xf32>
    %74 = arith.addf %73, %72 : vector<16x128xf32>
    %75 = arith.divf %73, %74 : vector<16x128xf32>
    %76 = vector.extract_strided_slice %63 {offsets = [32, 0], sizes = [16, 128], strides = [1, 1]} : vector<64x128xf32> to vector<16x128xf32>
    %77 = vector.extract_strided_slice %63 {offsets = [48, 0], sizes = [16, 128], strides = [1, 1]} : vector<64x128xf32> to vector<16x128xf32>
    %78 = arith.mulf %69, %77 : vector<16x128xf32>
    %79 = arith.addf %76, %78 : vector<16x128xf32>
    %80 = math.tanh %79 : vector<16x128xf32>
    %cst_25 = arith.constant 1.000000e+00 : f32
    %81 = vector.broadcast %cst_25 : f32 to vector<16x128xf32>
    %82 = arith.subf %81, %75 : vector<16x128xf32>
    %83 = arith.mulf %82, %80 : vector<16x128xf32>
    %84 = arith.mulf %75, %59 : vector<16x128xf32>
    %85 = arith.addf %83, %84 : vector<16x128xf32>
    %c192 = arith.constant 192 : index
    %c0_26 = arith.constant 0 : index
    %86 = vector.load %arg4[%c192, %c0_26] : memref<256x40xf32, #tpu.memory_space<vmem>>, vector<64x40xf32>
    %cst_27 = arith.constant dense<0.000000e+00> : vector<16x128xf32>
    %87 = tpu.matmul %85, %2, %cst_27 {dimension_numbers = #tpu.dot_dimension_numbers<[1], [0], [0], [1], [0, 0, 1, 1], [], []>} : vector<16x128xf32>, vector<128x128xf32>, vector<16x128xf32> -> vector<16x128xf32>
    %88 = tpu.concatenate %87, %85, %3 in 0 : vector<16x128xf32>, vector<16x128xf32>, vector<8x128xf32> -> vector<40x128xf32>
    %cst_28 = arith.constant dense<0.000000e+00> : vector<64x128xf32>
    %89 = tpu.matmul %86, %88, %cst_28 {dimension_numbers = #tpu.dot_dimension_numbers<[1], [0], [0], [1], [0, 0, 1, 1], [], []>} : vector<64x40xf32>, vector<40x128xf32>, vector<64x128xf32> -> vector<64x128xf32>
    %90 = vector.extract_strided_slice %89 {offsets = [0, 0], sizes = [16, 128], strides = [1, 1]} : vector<64x128xf32> to vector<16x128xf32>
    %91 = arith.negf %90 : vector<16x128xf32>
    %92 = math.exp %91 : vector<16x128xf32>
    %cst_29 = arith.constant 1.000000e+00 : f32
    %93 = vector.broadcast %cst_29 : f32 to vector<16x128xf32>
    %94 = arith.addf %93, %92 : vector<16x128xf32>
    %95 = arith.divf %93, %94 : vector<16x128xf32>
    %96 = vector.extract_strided_slice %89 {offsets = [16, 0], sizes = [16, 128], strides = [1, 1]} : vector<64x128xf32> to vector<16x128xf32>
    %97 = arith.negf %96 : vector<16x128xf32>
    %98 = math.exp %97 : vector<16x128xf32>
    %cst_30 = arith.constant 1.000000e+00 : f32
    %99 = vector.broadcast %cst_30 : f32 to vector<16x128xf32>
    %100 = arith.addf %99, %98 : vector<16x128xf32>
    %101 = arith.divf %99, %100 : vector<16x128xf32>
    %102 = vector.extract_strided_slice %89 {offsets = [32, 0], sizes = [16, 128], strides = [1, 1]} : vector<64x128xf32> to vector<16x128xf32>
    %103 = vector.extract_strided_slice %89 {offsets = [48, 0], sizes = [16, 128], strides = [1, 1]} : vector<64x128xf32> to vector<16x128xf32>
    %104 = arith.mulf %95, %103 : vector<16x128xf32>
    %105 = arith.addf %102, %104 : vector<16x128xf32>
    %106 = math.tanh %105 : vector<16x128xf32>
    %cst_31 = arith.constant 1.000000e+00 : f32
    %107 = vector.broadcast %cst_31 : f32 to vector<16x128xf32>
    %108 = arith.subf %107, %101 : vector<16x128xf32>
    %109 = arith.mulf %108, %106 : vector<16x128xf32>
    %110 = arith.mulf %101, %85 : vector<16x128xf32>
    %111 = arith.addf %109, %110 : vector<16x128xf32>
    %cst_32 = arith.constant 0.000000e+00 : f32
    %112 = vector.broadcast %cst_32 : f32 to vector<16x128xf32>
    %113 = arith.maximumf %111, %112 : vector<16x128xf32>
    %c0_33 = arith.constant 0 : index
    %c0_34 = arith.constant 0 : index
    %c0_35 = arith.constant 0 : index
    %114 = vector.load %arg3[%c0_33, %c0_34, %c0_35] : memref<1x128x8xf32, #tpu.memory_space<vmem>>, vector<1x128x8xf32>
    %115 = vector.shape_cast %114 : vector<1x128x8xf32> to vector<128x8xf32>
    %cst_36 = arith.constant dense<0.000000e+00> : vector<16x8xf32>
    %116 = tpu.matmul %113, %115, %cst_36 {dimension_numbers = #tpu.dot_dimension_numbers<[1], [0], [0], [1], [0, 0, 1, 1], [], []>} : vector<16x128xf32>, vector<128x8xf32>, vector<16x8xf32> -> vector<16x8xf32>
    %c0_37 = arith.constant 0 : index
    %c0_38 = arith.constant 0 : index
    %117 = vector.load %arg5[%c0_37, %c0_38] : memref<17x16xf32, #tpu.memory_space<vmem>>, vector<8x16xf32>
    %c8 = arith.constant 8 : index
    %c0_39 = arith.constant 0 : index
    %118 = vector.load %arg5[%c8, %c0_39] : memref<17x16xf32, #tpu.memory_space<vmem>>, vector<8x1xf32>
    %cst_40 = arith.constant dense<0.000000e+00> : vector<8x8xf32>
    %119 = tpu.matmul %117, %116, %cst_40 {dimension_numbers = #tpu.dot_dimension_numbers<[1], [0], [0], [1], [0, 0, 1, 1], [], []>} : vector<8x16xf32>, vector<16x8xf32>, vector<8x8xf32> -> vector<8x8xf32>
    %120 = vector.broadcast %118 : vector<8x1xf32> to vector<8x8xf32>
    %121 = arith.addf %119, %120 : vector<8x8xf32>
    %cst_41 = arith.constant 0.000000e+00 : f32
    %122 = vector.broadcast %cst_41 : f32 to vector<8x8xf32>
    %123 = arith.maximumf %121, %122 : vector<8x8xf32>
    %c0_42 = arith.constant 0 : index
    %c0_43 = arith.constant 0 : index
    %c0_44 = arith.constant 0 : index
    %124 = vector.load %arg7[%c0_42, %c0_43, %c0_44] : memref<1x8x8xf32, #tpu.memory_space<vmem>>, vector<1x8x8xf32>
    %125 = vector.shape_cast %124 : vector<1x8x8xf32> to vector<8x8xf32>
    %126 = arith.mulf %123, %125 : vector<8x8xf32>
    %c8_45 = arith.constant 8 : index
    %c1 = arith.constant 1 : index
    %127 = vector.load %arg5[%c8_45, %c1] : memref<17x16xf32, #tpu.memory_space<vmem>>, vector<8x1xf32>
    %c16 = arith.constant 16 : index
    %c0_46 = arith.constant 0 : index
    %128 = vector.load %arg5[%c16, %c0_46] : memref<17x16xf32, #tpu.memory_space<vmem>>, vector<1x1xf32>
    %129 = vector.broadcast %127 : vector<8x1xf32> to vector<8x8xf32>
    %130 = arith.mulf %129, %126 : vector<8x8xf32>
    %cst_47 = arith.constant dense<0.000000e+00> : vector<8xf32>
    %131 = vector.multi_reduction <add>, %130, %cst_47 [0] : vector<8x8xf32> to vector<8xf32>
    %132 = vector.shape_cast %131 : vector<8xf32> to vector<1x8xf32>
    %133 = vector.broadcast %128 : vector<1x1xf32> to vector<1x8xf32>
    %134 = arith.addf %132, %133 : vector<1x8xf32>
    %c0_48 = arith.constant 0 : index
    %c0_49 = arith.constant 0 : index
    %c0_50 = arith.constant 0 : index
    %135 = vector.load %arg8[%c0_48, %c0_49, %c0_50] : memref<1x1x8xf32, #tpu.memory_space<vmem>>, vector<1x1x8xf32>
    %136 = vector.shape_cast %135 : vector<1x1x8xf32> to vector<1x8xf32>
    %137 = vector.shape_cast %134 : vector<1x8xf32> to vector<1x1x8xf32>
    tpu.vector_store %arg8[%c0_48, %c0_49, %c0_50], %137 {strides = array<i32>} : memref<1x1x8xf32, #tpu.memory_space<vmem>>, vector<1x1x8xf32>,
    return
  }
  func.func @transform_0(%arg0: i32) -> (i32, i32) {
    %c0_i32 = arith.constant 0 : i32
    %c0_i32_0 = arith.constant 0 : i32
    return %c0_i32, %arg0 : i32, i32
  }
  func.func @transform_1(%arg0: i32) -> (i32, i32, i32) {
    %c0_i32 = arith.constant 0 : i32
    %c0_i32_0 = arith.constant 0 : i32
    %c0_i32_1 = arith.constant 0 : i32
    return %arg0, %c0_i32, %c0_i32_0 : i32, i32, i32
  }
  func.func @transform_2(%arg0: i32) -> (i32, i32, i32) {
    %c0_i32 = arith.constant 0 : i32
    %c0_i32_0 = arith.constant 0 : i32
    %c0_i32_1 = arith.constant 0 : i32
    return %arg0, %c0_i32, %c0_i32_0 : i32, i32, i32
  }
  func.func @transform_3(%arg0: i32) -> (i32, i32) {
    %c0_i32 = arith.constant 0 : i32
    %c0_i32_0 = arith.constant 0 : i32
    %c0_i32_1 = arith.constant 0 : i32
    return %c0_i32, %c0_i32_0 : i32, i32
  }
  func.func @transform_4(%arg0: i32) -> (i32, i32) {
    %c0_i32 = arith.constant 0 : i32
    %c0_i32_0 = arith.constant 0 : i32
    %c0_i32_1 = arith.constant 0 : i32
    return %c0_i32, %c0_i32_0 : i32, i32
  }
  func.func @transform_5(%arg0: i32) -> (i32, i32) {
    %c0_i32 = arith.constant 0 : i32
    %c0_i32_0 = arith.constant 0 : i32
    return %c0_i32, %arg0 : i32, i32
  }
  func.func @transform_6(%arg0: i32) -> (i32, i32, i32) {
    %c0_i32 = arith.constant 0 : i32
    %c0_i32_0 = arith.constant 0 : i32
    %c0_i32_1 = arith.constant 0 : i32
    return %arg0, %c0_i32, %c0_i32_0 : i32, i32, i32
  }
  func.func @transform_7(%arg0: i32) -> (i32, i32, i32) {
    %c0_i32 = arith.constant 0 : i32
    %c0_i32_0 = arith.constant 0 : i32
    %c0_i32_1 = arith.constant 0 : i32
    return %arg0, %c0_i32, %c0_i32_0 : i32, i32, i32
  }
}

</mosaic_0001>

<bundles_post_ra>
// kernel: tpu_custom_call.1
= control target key start
LH: loop header
LB: loop body
LE: loop exit
PB: predicated region body
PF: predicated region fallthrough
CT: control target
= control target key end

     0   :  { %12 = vsyncpa [#allocation5], 0  ;;  %s3025_s0 = inlined_call_operand.vmem [shape: f32[16,256], index: 0, kind: input, shape index: {}]   ;;  %s3026_s1 = inlined_call_operand.vmem [shape: f32[2,128,128], index: 1, kind: input, shape index: {}]   ;;  %s3027_s2 = inlined_call_operand.vmem [shape: f32[2,128,8], index: 2, kind: input, shape index: {}]   ;;  %s3028_s3 = inlined_call_operand.vmem [shape: f32[256,40], index: 3, kind: input, shape index: {}]   ;;  %s3029_s4 = inlined_call_operand.vmem [shape: f32[17,16], index: 4, kind: input, shape index: {}]   ;;  %s3030_s5 = inlined_call_operand.vmem [shape: f32[16,256], index: 5, kind: input, shape index: {}]   ;;  %s3031_s6 = inlined_call_operand.vmem [shape: f32[2,8,8], index: 6, kind: input, shape index: {}]   ;;  %s3032_s7 = inlined_call_operand.hbm [shape: f32[2,1,8], index: 7, kind: output, shape index: {}]  }
   0x1   :  { %14 = vsyncpa [#allocation5 + $0x1], 0  ;;  %s2503_s24 = smov 0   ;;  %s2505_s25 = smov 0  }
   0x2   :  { %s2507_s26 = smov 0   ;;  %s2509_s27 = smov 0  }
   0x3 LB: > { %s2524_s28 = sadd.s32 4294967295, %s2455_s27   ;;  %s1783_s29 = sadd.s32 4294967294, %s2455_s27   ;;  %s2455_s27 = sphi %s2509_s27, %s3041_s27   ;;  %s2451_s26 = sphi %s2507_s26, %s3040_s26   ;;  %s2447_s25 = sphi %s2505_s25, %s3039_s25   ;;  %s2443_s24 = sphi %s2503_s24, %s3038_s24  }
   0x4   : > { %s2528_s30 = sadd.s32 1, %s2455_s27   ;;  %s27_s8 = sadd.s32 1, %s2451_s26 }
   0x5   : > { %s24_s9 = ssub.s32 %s2455_s27, %s2528_s30  ;;  %p34_p0 = scmp.ne.s32.totalorder %s2451_s26, %s2447_s25 }
   0x6   : > { %p25_p1 = scmp.eq.s32.totalorder %s24_s9, 0  ;;  %p35_p2 = scmp.eq.s32.totalorder %s2455_s27, 0 }
   0x7   : > { %p210_p3 = scmp.eq.s32.totalorder %s2524_s28, 1  ;;  %p215_p4 = scmp.ne.s32.totalorder %s2447_s25, %s2443_s24 }
   0x8   : > { %s2540_s10 = scalar_select %p25_p1, %s2451_s26, %s27_s8  }
   0x9   : > { %p2542_p5 = por %p35_p2, %p34_p0  ;;  %p2546_p6 = por %p210_p3, %p34_p0 }
   0xa   : > { %p216_p7 = scmp.eq.s32.totalorder %s1783_s29, 1  ;;  %p3033_p9 = scmp.ge.s32.totalorder %s2455_s27, 2 }
   0xc   : > { %p2550_p8 = por %p216_p7, %p215_p4  ;;  %238 = sbr.rel (%p3033_p9) target bundleno = 27 (0x1b), region = 24 }
  0x11   : > { %241 = sbr.rel (!%p2542_p5) target bundleno = 22 (0x16), region = 28  ;;  %s243_s14 = sand.u32 (%p2542_p5), 1, %s2451_s26  }
  0x12   : > { %s1787_s15 = sshll.u32 (%p2542_p5), %s2455_s27, 3  ;;  %s1786_s16 = sshll.u32 (%p2542_p5), %s243_s14, 4 }
  0x13   : > { %s247_s19 = scalar_lea.vmem (%p2542_p5), %s3025_s0, %s1787_s15  ;;  %s245_s20 = scalar_lea.vmem (%p2542_p5), [#allocation2], %s1786_s16 }
  0x14   : > { %v278_v0 = vld [vmem:[%s247_s19] sm:$0xff] (%p2542_p5)  ;;  %v280_v1 = vld [vmem:[%s247_s19 + $0x10] sm:$0xff] (%p2542_p5) }
  0x15   : > { %279 = vst [vmem:[%s245_s20] sm:$0xff] (%p2542_p5), %v278_v0  ;;  %281 = vst [vmem:[%s245_s20 + $0x8] sm:$0xff] (%p2542_p5), %v280_v1 }
  0x16 PF: > { %303 = sbr.rel (!%p2542_p5) target bundleno = 27 (0x1b), region = 74  ;;  %s305_s21 = sand.u32 (%p2542_p5), 1, %s2451_s26  }
  0x17   : > { %s1789_s22 = sshll.u32 (%p2542_p5), %s2455_s27, 3  ;;  %s1788_s23 = sshll.u32 (%p2542_p5), %s305_s21, 4 }
  0x18   : > { %s309_s9 = scalar_lea.vmem (%p2542_p5), %s3030_s5, %s1789_s22  ;;  %s307_s14 = scalar_lea.vmem (%p2542_p5), [#allocation3], %s1788_s23 }
  0x19   : > { %v340_v2 = vld [vmem:[%s309_s9] sm:$0xff] (%p2542_p5)  ;;  %v342_v3 = vld [vmem:[%s309_s9 + $0x10] sm:$0xff] (%p2542_p5) }
  0x1a   : > { %341 = vst [vmem:[%s307_s14] sm:$0xff] (%p2542_p5), %v340_v2  ;;  %343 = vst [vmem:[%s307_s14 + $0x8] sm:$0xff] (%p2542_p5), %v342_v3 }
  0x1b PF: > { %p1790_p10 = scmp.ge.s32.totalorder %s2455_s27, 1  ;;  %p355_p11 = scmp.lt.s32.totalorder %s2455_s27, 3 }
  0x1d   : > { %p356_p12 = pnand %p1790_p10, %p355_p11 }
  0x1e   : > { %p417_p13 = scmp.lt.s32.totalorder (!%p356_p12), %s2524_s28, 1  ;;  %s2575_s11 = sand.u32 (!%p356_p12), 1, %s2447_s25  }
  0x1f   : > { %359 = sbr.rel (%p356_p12) target bundleno = 2292 (0x8f4), region = 116  ;;  %s1791_s15 = sshll.u32 (!%p356_p12), %s2575_s11, 4 }
  0x20   : > { %s364_s18 = scalar_lea.vmem (!%p356_p12), [#allocation2], %s1791_s15  ;;  %s371_s29 = scalar_lea.vmem (!%p356_p12), [#allocation3], %s1791_s15 }
  0x21   : > { %s416_s15 = scalar_lea.vmem (!%p356_p12), [#allocation4], %s2575_s11  ;;  %s2462_s20 = smov (!%p356_p12), [#allocation4]  }
  0x24   : > { %v2457_v4 = vmov 1.0   ;;  %s2580_s16 = scalar_select %p417_p13, %s2524_s28, 1  ;;  %v2586_v5 = vld [vmem:[%s364_s18] sm:$0xff]  ;;  %v2596_v6 = vld [vmem:[%s364_s18 + $0x8] sm:$0xff]  ;;  %vm532_vm0 = vcmask 326656   ;;  %vm2459_vm1 = vmmov 0  }
  0x25   : > { %2032 = vmatprep.subr.mxu1 %v2457_v4  ;;  %2029 = vmatprep.mubr.f32.mxu0 %v2586_v5  ;;  %v449_v23 = vld [vmem:[%s3028_s3] sm:$0xff]  ;;  %v450_v26 = vld [vmem:[%s3028_s3 + $0x8] sm:$0xff]  ;;  %v451_v27 = vld [vmem:[%s3028_s3 + $0x10] sm:$0xff]  ;;  %vm1556_vm2 = vcmask 130048   ;;  %vm1639_vm3 = vcmask 64512   ;;  %vm1653_vm4 = vcmask 57344  }
  0x26   : > { %2033 = vmatpush3.msra.mxu1 %v2457_v4  ;;  %s1850_s17 = sshll.u32 %s2580_s16, 7  ;;  %2042 = vmatprep.mubr.msk.f32.mxu1 %vm532_vm0, %v449_v23  ;;  %v452_v28 = vld [vmem:[%s3028_s3 + $0x18] sm:$0xff]  ;;  %v453_v29 = vld [vmem:[%s3028_s3 + $0x20] sm:$0xff]  ;;  %v454_v30 = vld [vmem:[%s3028_s3 + $0x28] sm:$0xff]  ;;  %s1656_s18 = scalar_lea.sflag [#allocation5], %s2575_s11 }
  0x27   : > { %s2593_s21 = scalar_lea.vmem %s3026_s1, %s1850_s17  ;;  %2034 = vmatprep.subr.mxu1 %v2596_v6  ;;  %v455_v31 = vld [vmem:[%s3028_s3 + $0x30] sm:$0xff]  ;;  %v456_v32 = vld [vmem:[%s3028_s3 + $0x38] sm:$0xff]  ;;  %s2956_s8 = scalar_lea.vmem %s3027_s2, %s1850_s17 }
  0x28   : > { %v2599_v7 = vld [vmem:[%s2593_s21 + $0x78] sm:$0xff]  ;;  %v2602_v8 = vld [vmem:[%s2593_s21 + $0x70] sm:$0xff]  ;;  %2035 = vmatpush3.msra.mxu1 %v2596_v6  ;;  %v2609_v9 = vld [vmem:[%s2593_s21 + $0x68] sm:$0xff] }
  0x29   : > { %1997 = vmatprep.subr.mxu0 %v2599_v7  ;;  %2036 = vmatprep.subr.mxu1 %v2586_v5  ;;  %v2616_v10 = vld [vmem:[%s2593_s21 + $0x60] sm:$0xff]  ;;  %v2621_v11 = vld [vmem:[%s2593_s21 + $0x58] sm:$0xff]  ;;  %v2626_v12 = vld [vmem:[%s2593_s21 + $0x50] sm:$0xff] }
  0x2a   : > { %1998 = vmatpush3.msra.mxu0 %v2599_v7  ;;  %2037 = vmatpush3.msra.mxu1 %v2586_v5  ;;  %v2631_v13 = vld [vmem:[%s2593_s21 + $0x48] sm:$0xff]  ;;  %v2636_v14 = vld [vmem:[%s2593_s21 + $0x40] sm:$0xff]  ;;  %v2641_v15 = vld [vmem:[%s2593_s21 + $0x38] sm:$0xff] }
  0x2b   : > { %1999 = vmatprep.subr.mxu0 %v2602_v8  ;;  %v2646_v16 = vld [vmem:[%s2593_s21 + $0x30] sm:$0xff]  ;;  %v2651_v17 = vld [vmem:[%s2593_s21 + $0x28] sm:$0xff]  ;;  %v2656_v18 = vld [vmem:[%s2593_s21 + $0x20] sm:$0xff] }
  0x2c   : > { %2000 = vmatpush3.msra.mxu0 %v2602_v8  ;;  %v2661_v19 = vld [vmem:[%s2593_s21 + $0x18] sm:$0xff]  ;;  %v2666_v20 = vld [vmem:[%s2593_s21 + $0x10] sm:$0xff]  ;;  %v2671_v21 = vld [vmem:[%s2593_s21 + $0x8] sm:$0xff] }
  0x2d   : > { %2001 = vmatprep.subr.mxu0 %v2609_v9  ;;  %v2676_v22 = vld [vmem:[%s2593_s21] sm:$0xff]  ;;  %s1797_s21 = sshll.u32 %s2580_s16, 3  ;;  %s1847_s16 = sshll.u32 %s2524_s28, 4 }
  0x2e   : > { %2002 = vmatpush3.msra.mxu0 %v2609_v9  ;;  %s1666_s14 = scalar_lea.hbm %s3032_s7, %s1847_s16 }
  0x2f   : > { %2003 = vmatprep.subr.mxu0 %v2616_v10 }
  0x30   : > { %2004 = vmatpush3.msra.mxu0 %v2616_v10 }
  0x31   : > { %2005 = vmatprep.subr.mxu0 %v2621_v11 }
  0x32   : > { %2006 = vmatpush3.msra.mxu0 %v2621_v11 }
  0x33   : > { %2007 = vmatprep.subr.mxu0 %v2626_v12 }
  0x34   : > { %2008 = vmatpush3.msra.mxu0 %v2626_v12 }
  0x35   : > { %2009 = vmatprep.subr.mxu0 %v2631_v13 }
  0x36   : > { %2010 = vmatpush3.msra.mxu0 %v2631_v13 }
  0x37   : > { %2011 = vmatprep.subr.mxu0 %v2636_v14 }
  0x38   : > { %2012 = vmatpush3.msra.mxu0 %v2636_v14 }
  0x39   : > { %2013 = vmatprep.subr.mxu0 %v2641_v15 }
  0x3a   : > { %2014 = vmatpush3.msra.mxu0 %v2641_v15 }
  0x3b   : > { %2015 = vmatprep.subr.mxu0 %v2646_v16 }
  0x3c   : > { %2016 = vmatpush3.msra.mxu0 %v2646_v16 }
  0x3d   : > { %2017 = vmatprep.subr.mxu0 %v2651_v17 }
  0x3e   : > { %2018 = vmatpush3.msra.mxu0 %v2651_v17 }
  0x3f   : > { %2019 = vmatprep.subr.mxu0 %v2656_v18 }
  0x40   : > { %2020 = vmatpush3.msra.mxu0 %v2656_v18 }
  0x41   : > { %2021 = vmatprep.subr.mxu0 %v2661_v19 }
  0x42   : > { %2022 = vmatpush3.msra.mxu0 %v2661_v19 }
  0x43   : > { %2023 = vmatprep.subr.mxu0 %v2666_v20 }
  0x44   : > { %2024 = vmatpush3.msra.mxu0 %v2666_v20 }
  0x45   : > { %2025 = vmatprep.subr.mxu0 %v2671_v21 }
  0x46   : > { %2026 = vmatpush3.msra.mxu0 %v2671_v21 }
  0x47   : > { %2027 = vmatprep.subr.mxu0 %v2676_v22 }
  0x48   : > { %2028 = vmatpush3.msra.mxu0 %v2676_v22 }
  0x49   : > { %2030 = vmatmul.mubr.f32.vlgmr.msra.gmra.mxu0 %v2596_v6  ;;  %2111 = vmatprep.subr.mxu0 %v2599_v7 }
  0x4a   : > { %2112 = vmatpush3.msra.mxu0 %v2599_v7 }
  0x4b   : > { %2113 = vmatprep.subr.mxu0 %v2602_v8 }
  0x4c   : > { %2114 = vmatpush3.msra.mxu0 %v2602_v8 }
  0x4d   : > { %2115 = vmatprep.subr.mxu0 %v2609_v9 }
  0x4e   : > { %2116 = vmatpush3.msra.mxu0 %v2609_v9 }
  0x4f   : > { %2117 = vmatprep.subr.mxu0 %v2616_v10 }
  0x50   : > { %2118 = vmatpush3.msra.mxu0 %v2616_v10 }
  0x51   : > { %2119 = vmatprep.subr.mxu0 %v2621_v11 }
  0x52   : > { %2120 = vmatpush3.msra.mxu0 %v2621_v11 }
  0x53   : > { %2121 = vmatprep.subr.mxu0 %v2626_v12 }
  0x54   : > { %2122 = vmatpush3.msra.mxu0 %v2626_v12 }
  0x55   : > { %2123 = vmatprep.subr.mxu0 %v2631_v13 }
  0x56   : > { %2124 = vmatpush3.msra.mxu0 %v2631_v13 }
  0x57   : > { %2125 = vmatprep.subr.mxu0 %v2636_v14 }
  0x58   : > { %2126 = vmatpush3.msra.mxu0 %v2636_v14 }
  0x59   : > { %2127 = vmatprep.subr.mxu0 %v2641_v15 }
  0x5a   : > { %2128 = vmatpush3.msra.mxu0 %v2641_v15 }
  0x5b   : > { %2129 = vmatprep.subr.mxu0 %v2646_v16 }
  0x5c   : > { %2130 = vmatpush3.msra.mxu0 %v2646_v16 }
  0x5d   : > { %2131 = vmatprep.subr.mxu0 %v2651_v17 }
  0x5e   : > { %2132 = vmatpush3.msra.mxu0 %v2651_v17 }
  0x5f   : > { %2133 = vmatprep.subr.mxu0 %v2656_v18 }
  0x60   : > { %2134 = vmatpush3.msra.mxu0 %v2656_v18 }
  0x61   : > { %2135 = vmatprep.subr.mxu0 %v2661_v19 }
  0x62   : > { %2136 = vmatpush3.msra.mxu0 %v2661_v19 }
  0x63   : > { %2137 = vmatprep.subr.mxu0 %v2666_v20 }
  0x64   : > { %2138 = vmatpush3.msra.mxu0 %v2666_v20 }
  0x65   : > { %2139 = vmatprep.subr.mxu0 %v2671_v21 }
  0x66   : > { %2140 = vmatpush3.msra.mxu0 %v2671_v21 }
  0x67   : > { %2141 = vmatprep.subr.mxu0 %v2676_v22 }
  0x68   : > { %2142 = vmatpush3.msra.mxu0 %v2676_v22 }
  0x69   : > { %2203 = vmatprep.subr.mxu0 %v2457_v4 }
 0x109   : > { %v2031_v24 = vpop.f32.mrf.mxu0 }
 0x10a   : > { %2038 = vmatprep.subr.mxu1 %v2031_v24 }
 0x10b   : > { %v523_v25 = vpop.f32.mrf.mxu0  ;;  %2039 = vmatpush3.msra.mxu1 %v2031_v24 }
 0x10c   : > { %2040 = vmatprep.subr.mxu1 %v523_v25 }
 0x10d   : > { %2041 = vmatpush3.msra.mxu1 %v523_v25 }
 0x10e   : > { %2043 = vmatmul.mubr.msk.f32.vlgmr.msra.gmra.mxu1 %vm532_vm0, %v450_v26  ;;  %2054 = vmatprep.subr.mxu1 %v2599_v7 }
 0x10f   : > { %2045 = vmatprep.mubr.msk.f32.mxu1 %vm532_vm0, %v451_v27  ;;  %2055 = vmatpush3.msra.mxu1 %v2599_v7  ;;  %v701_v27 = vld [vmem:[%s3028_s3 + $0x48] sm:$0xff] }
 0x110   : > { %2056 = vmatprep.subr.mxu1 %v2602_v8 }
 0x111   : > { %2057 = vmatpush3.msra.mxu1 %v2602_v8 }
 0x112   : > { %2046 = vmatmul.mubr.msk.f32.gmra.mxu1 %vm532_vm0, %v452_v28  ;;  %2058 = vmatprep.subr.mxu1 %v2609_v9  ;;  %v702_v28 = vld [vmem:[%s3028_s3 + $0x50] sm:$0xff] }
 0x113   : > { %2048 = vmatprep.mubr.msk.f32.mxu1 %vm532_vm0, %v453_v29  ;;  %2059 = vmatpush3.msra.mxu1 %v2609_v9  ;;  %v703_v29 = vld [vmem:[%s3028_s3 + $0x58] sm:$0xff] }
 0x114   : > { %2060 = vmatprep.subr.mxu1 %v2616_v10 }
 0x115   : > { %2061 = vmatpush3.msra.mxu1 %v2616_v10 }
 0x116   : > { %2049 = vmatmul.mubr.msk.f32.gmra.mxu1 %vm532_vm0, %v454_v30  ;;  %2062 = vmatprep.subr.mxu1 %v2621_v11  ;;  %v704_v30 = vld [vmem:[%s3028_s3 + $0x60] sm:$0xff] }
 0x117   : > { %2051 = vmatprep.mubr.msk.f32.mxu1 %vm532_vm0, %v455_v31  ;;  %2063 = vmatpush3.msra.mxu1 %v2621_v11  ;;  %v705_v31 = vld [vmem:[%s3028_s3 + $0x68] sm:$0xff] }
 0x118   : > { %2064 = vmatprep.subr.mxu1 %v2626_v12 }
 0x119   : > { %2065 = vmatpush3.msra.mxu1 %v2626_v12 }
 0x11a   : > { %2052 = vmatmul.mubr.msk.f32.gmra.mxu1 %vm532_vm0, %v456_v32  ;;  %2066 = vmatprep.subr.mxu1 %v2631_v13  ;;  %v706_v32 = vld [vmem:[%s3028_s3 + $0x70] sm:$0xff] }
 0x11b   : > { %2067 = vmatpush3.msra.mxu1 %v2631_v13 }
 0x11c   : > { %2068 = vmatprep.subr.mxu1 %v2636_v14 }
 0x11d   : > { %2069 = vmatpush3.msra.mxu1 %v2636_v14 }
 0x11e   : > { %2070 = vmatprep.subr.mxu1 %v2641_v15 }
 0x11f   : > { %2071 = vmatpush3.msra.mxu1 %v2641_v15 }
 0x120   : > { %2072 = vmatprep.subr.mxu1 %v2646_v16 }
 0x121   : > { %2073 = vmatpush3.msra.mxu1 %v2646_v16 }
 0x122   : > { %2074 = vmatprep.subr.mxu1 %v2651_v17 }
 0x123   : > { %2075 = vmatpush3.msra.mxu1 %v2651_v17 }
 0x124   : > { %2076 = vmatprep.subr.mxu1 %v2656_v18 }
 0x125   : > { %2077 = vmatpush3.msra.mxu1 %v2656_v18 }
 0x126   : > { %2078 = vmatprep.subr.mxu1 %v2661_v19 }
 0x127   : > { %2079 = vmatpush3.msra.mxu1 %v2661_v19 }
 0x128   : > { %2080 = vmatprep.subr.mxu1 %v2666_v20 }
 0x129   : > { %2081 = vmatpush3.msra.mxu1 %v2666_v20 }
 0x12a   : > { %2082 = vmatprep.subr.mxu1 %v2671_v21 }
 0x12b   : > { %2083 = vmatpush3.msra.mxu1 %v2671_v21 }
 0x12c   : > { %2084 = vmatprep.subr.mxu1 %v2676_v22 }
 0x12d   : > { %2085 = vmatpush3.msra.mxu1 %v2676_v22 }
 0x12e   : > { %2089 = vmatprep.subr.mxu1 %v2457_v4 }
 0x1ce   : > { %v2044_v33 = vpop.f32.mrf.mxu1 }
 0x1cf   : > { %v1807_v34 = vmul.f32 -1.442695, %v2044_v33  ;;  %v707_v33 = vld [vmem:[%s3028_s3 + $0x78] sm:$0xff] }
 0x1d0   : > { %v623_v35 = vpop.f32.mrf.mxu1 }
 0x1d1   : > { %2315 = vpow2.f32 %v1807_v34  ;;  %v1806_v36 = vmul.f32 -1.442695, %v623_v35 }
 0x1d2   : > { %v2047_v37 = vpop.f32.mrf.mxu1 }
 0x1d3   : > { %2317 = vpow2.f32 %v1806_v36  ;;  %v1809_v38 = vmul.f32 -1.442695, %v2047_v37 }
 0x1d4   : > { %v633_v39 = vpop.f32.mrf.mxu1 }
 0x1d5   : > { %v1808_v40 = vmul.f32 -1.442695, %v633_v39  ;;  %2319 = vpow2.f32 %v1809_v38 }
 0x1d6   : > { %v2050_v45 = vpop.f32.mrf.mxu1 }
 0x1d7   : > { %2321 = vpow2.f32 %v1808_v40 }
 0x1d8   : > { %v643_v47 = vpop.f32.mrf.mxu1 }
 0x1da   : > { %v2053_v50 = vpop.f32.mrf.mxu1 }
 0x1dc   : > { %v653_v55 = vpop.f32.mrf.mxu1 }
 0x1de   : > { %v2316_v41 = vpop.eup %2315 }
 0x1df   : > { %v669_v42 = vadd.f32 1.0, %v2316_v41 }
 0x1e0   : > { %v2318_v43 = vpop.eup %2317 }
 0x1e1   : > { %2323 = vrcp.f32 %v669_v42  ;;  %v668_v44 = vadd.f32 1.0, %v2318_v43 }
 0x1e2   : > { %v2320_v46 = vpop.eup %2319 }
 0x1e3   : > { %2325 = vrcp.f32 %v668_v44  ;;  %v681_v49 = vadd.f32 1.0, %v2320_v46 }
 0x1e4   : > { %v2322_v48 = vpop.eup %2321 }
 0x1e5   : > { %v680_v51 = vadd.f32 1.0, %v2322_v48  ;;  %2327 = vrcp.f32 %v681_v49 }
 0x1e7   : > { %2329 = vrcp.f32 %v680_v51 }
 0x1ee   : > { %v2324_v52 = vpop.eup %2323 }
 0x1ef   : > { %v687_v53 = vmul.f32 %v2324_v52, %v2053_v50 }
 0x1f0   : > { %v2326_v54 = vpop.eup %2325 }
 0x1f1   : > { %v689_v56 = vadd.f32 %v2050_v45, %v687_v53  ;;  %v686_v57 = vmul.f32 %v2326_v54, %v653_v55 }
 0x1f2   : > { %v2328_v59 = vpop.eup %2327 }
 0x1f3   : > { %2331 = vtanh.f32 %v689_v56  ;;  %v688_v58 = vadd.f32 %v686_v57, %v643_v47  ;;  %v693_v61 = vsub.f32 1.0, %v2328_v59  ;;  %v697_v23 = vmul.f32 %v2328_v59, %v2596_v6 }
 0x1f4   : > { %v2330_v60 = vpop.eup %2329 }
 0x1f5   : > { %2333 = vtanh.f32 %v688_v58  ;;  %v692_v63 = vsub.f32 1.0, %v2330_v60  ;;  %v696_v3 = vmul.f32 %v2330_v60, %v2586_v5  ;;  %v700_v5 = vld [vmem:[%s3028_s3 + $0x40] sm:$0xff] }
 0x200   : > { %v2332_v62 = vpop.eup %2331 }
 0x201   : > { %v695_v1 = vmul.f32 %v2332_v62, %v693_v61 }
 0x202   : > { %v2334_v0 = vpop.eup %2333 }
 0x203   : > { %v694_v2 = vmul.f32 %v2334_v0, %v692_v63  ;;  %v2785_v25 = vadd.f32 %v697_v23, %v695_v1 }
 0x205   : > { %v2783_v24 = vadd.f32 %v696_v3, %v694_v2 }
 0x207   : > { %2086 = vmatprep.mubr.f32.mxu1 %v2783_v24 }
 0x208   : > { %2087 = vmatmul.mubr.f32.vlgmr.msra.gmra.mxu1 %v2785_v25 }
 0x209   : > { %2090 = vmatpush3.msra.mxu1 %v2457_v4  ;;  %2099 = vmatprep.mubr.msk.f32.mxu1 %vm532_vm0, %v700_v5 }
 0x20a   : > { %2091 = vmatprep.subr.mxu1 %v2785_v25 }
 0x20b   : > { %2092 = vmatpush3.msra.mxu1 %v2785_v25 }
 0x20c   : > { %2093 = vmatprep.subr.mxu1 %v2783_v24 }
 0x20d   : > { %2094 = vmatpush3.msra.mxu1 %v2783_v24 }
 0x2c8   : > { %v2088_v6 = vpop.f32.mrf.mxu1 }
 0x2c9   : > { %2095 = vmatprep.subr.mxu1 %v2088_v6 }
 0x2ca   : > { %v774_v26 = vpop.f32.mrf.mxu1  ;;  %2096 = vmatpush3.msra.mxu1 %v2088_v6 }
 0x2cb   : > { %2097 = vmatprep.subr.mxu1 %v774_v26 }
 0x2cc   : > { %2098 = vmatpush3.msra.mxu1 %v774_v26  ;;  %v953_v26 = vld [vmem:[%s371_s29 + $0x8] sm:$0xff] }
 0x2cd   : > { %2100 = vmatmul.mubr.msk.f32.vlgmr.msra.gmra.mxu1 %vm532_vm0, %v701_v27  ;;  %2146 = vmatprep.subr.mxu1 %v2457_v4 }
 0x2ce   : > { %2102 = vmatprep.mubr.msk.f32.mxu1 %vm532_vm0, %v702_v28  ;;  %2147 = vmatpush3.msra.mxu1 %v2457_v4 }
 0x2d1   : > { %2103 = vmatmul.mubr.msk.f32.gmra.mxu1 %vm532_vm0, %v703_v29  ;;  %v952_v29 = vld [vmem:[%s371_s29] sm:$0xff]  ;;  %s430_s29 = scalar_lea.vmem %s3031_s6, %s1797_s21  ;;  %s2399_s21 = sshll.u32 %s2462_s20, 4  ;;  %s2400_s21 = int_to_ptr.vmem [resolvable:$false] %s2399_s21 }
 0x2d2   : > { %2105 = vmatprep.mubr.msk.f32.mxu1 %vm532_vm0, %v704_v30  ;;  %s2401_s28 = scalar_lea.vmem %s2400_s21, 32 }
 0x2d5   : > { %2106 = vmatmul.mubr.msk.f32.gmra.mxu1 %vm532_vm0, %v705_v31 }
 0x2d6   : > { %2108 = vmatprep.mubr.msk.f32.mxu1 %vm532_vm0, %v706_v32 }
 0x2d9   : > { %2109 = vmatmul.mubr.msk.f32.gmra.mxu1 %vm532_vm0, %v707_v33 }
 0x38d   : > { %v2101_v34 = vpop.f32.mrf.mxu1 }
 0x38e   : > { %v1819_v35 = vmul.f32 -1.442695, %v2101_v34  ;;  %v957_v34 = vld [vmem:[%s3028_s3 + $0x88] sm:$0xff] }
 0x38f   : > { %v873_v36 = vpop.f32.mrf.mxu1 }
 0x390   : > { %2335 = vpow2.f32 %v1819_v35  ;;  %v1818_v37 = vmul.f32 -1.442695, %v873_v36  ;;  %v958_v35 = vld [vmem:[%s3028_s3 + $0x90] sm:$0xff]  ;;  %v960_v36 = vld [vmem:[%s3028_s3 + $0xa0] sm:$0xff] }
 0x391   : > { %v2104_v38 = vpop.f32.mrf.mxu1 }
 0x392   : > { %2337 = vpow2.f32 %v1818_v37  ;;  %v1821_v39 = vmul.f32 -1.442695, %v2104_v38  ;;  %v961_v37 = vld [vmem:[%s3028_s3 + $0xa8] sm:$0xff] }
 0x393   : > { %v883_v40 = vpop.f32.mrf.mxu1 }
 0x394   : > { %v1820_v41 = vmul.f32 -1.442695, %v883_v40  ;;  %2339 = vpow2.f32 %v1821_v39 }
 0x395   : > { %v2107_v46 = vpop.f32.mrf.mxu1 }
 0x396   : > { %2341 = vpow2.f32 %v1820_v41 }
 0x397   : > { %v893_v48 = vpop.f32.mrf.mxu1 }
 0x399   : > { %v2110_v51 = vpop.f32.mrf.mxu1 }
 0x39b   : > { %v903_v56 = vpop.f32.mrf.mxu1 }
 0x39d   : > { %v2336_v42 = vpop.eup %2335 }
 0x39e   : > { %v919_v43 = vadd.f32 1.0, %v2336_v42 }
 0x39f   : > { %v2338_v44 = vpop.eup %2337 }
 0x3a0   : > { %2343 = vrcp.f32 %v919_v43  ;;  %v918_v45 = vadd.f32 1.0, %v2338_v44 }
 0x3a1   : > { %v2340_v47 = vpop.eup %2339 }
 0x3a2   : > { %2345 = vrcp.f32 %v918_v45  ;;  %v931_v50 = vadd.f32 1.0, %v2340_v47 }
 0x3a3   : > { %v2342_v49 = vpop.eup %2341 }
 0x3a4   : > { %v930_v53 = vadd.f32 1.0, %v2342_v49  ;;  %2347 = vrcp.f32 %v931_v50 }
 0x3a6   : > { %2349 = vrcp.f32 %v930_v53 }
 0x3ad   : > { %v2344_v52 = vpop.eup %2343 }
 0x3ae   : > { %v937_v54 = vmul.f32 %v2344_v52, %v2110_v51 }
 0x3af   : > { %v2346_v55 = vpop.eup %2345 }
 0x3b0   : > { %v939_v57 = vadd.f32 %v2107_v46, %v937_v54  ;;  %v936_v58 = vmul.f32 %v2346_v55, %v903_v56 }
 0x3b1   : > { %v2348_v60 = vpop.eup %2347 }
 0x3b2   : > { %2351 = vtanh.f32 %v939_v57  ;;  %v938_v59 = vadd.f32 %v936_v58, %v893_v48  ;;  %v943_v61 = vsub.f32 1.0, %v2348_v60  ;;  %v947_v1 = vmul.f32 %v2348_v60, %v2785_v25 }
 0x3b3   : > { %v2350_v62 = vpop.eup %2349 }
 0x3b4   : > { %2353 = vtanh.f32 %v938_v59  ;;  %v942_v2 = vsub.f32 1.0, %v2350_v62  ;;  %v946_v6 = vmul.f32 %v2350_v62, %v2783_v24  ;;  %v956_v24 = vld [vmem:[%s3028_s3 + $0x80] sm:$0xff] }
 0x3b5   : > { %2156 = vmatprep.mubr.msk.f32.mxu1 %vm532_vm0, %v956_v24  ;;  %v1206_v62 = vld [vmem:[%s3028_s3 + $0xc0] sm:$0xff]  ;;  %v1467_v24 = vld [vmem:[%s2956_s8 + $0x48] sm:$0xff] }
 0x3bf   : > { %v2352_v63 = vpop.eup %2351 }
 0x3c0   : > { %v945_v0 = vmul.f32 %v2352_v63, %v943_v61 }
 0x3c1   : > { %v2354_v3 = vpop.eup %2353 }
 0x3c2   : > { %v949_v23 = vadd.f32 %v947_v1, %v945_v0  ;;  %v944_v5 = vmul.f32 %v2354_v3, %v942_v2  ;;  %v1207_v1 = vld [vmem:[%s3028_s3 + $0xc8] sm:$0xff]  ;;  %v1208_v2 = vld [vmem:[%s3028_s3 + $0xd0] sm:$0xff]  ;;  %v1209_v3 = vld [vmem:[%s3028_s3 + $0xd8] sm:$0xff] }
 0x3c4   : > { %v951_v27 = vmax.f32 %v949_v23, 0.0  ;;  %v948_v28 = vadd.f32 %v946_v6, %v944_v5  ;;  %v1210_v23 = vld [vmem:[%s3028_s3 + $0xe0] sm:$0xff]  ;;  %v1211_v5 = vld [vmem:[%s3028_s3 + $0xe8] sm:$0xff]  ;;  %v1212_v6 = vld [vmem:[%s3028_s3 + $0xf0] sm:$0xff] }
 0x3c6   : > { %v2832_v30 = vmul.f32 %v953_v26, %v951_v27  ;;  %v950_v31 = vmax.f32 %v948_v28, 0.0  ;;  %v1213_v26 = vld [vmem:[%s3028_s3 + $0xf8] sm:$0xff]  ;;  %v1472_v28 = vld [vmem:[%s2956_s8 + $0x70] sm:$0xff] }
 0x3c7   : > { %v1473_v27 = vld [vmem:[%s2956_s8 + $0x78] sm:$0xff] }
 0x3c8   : > { %2148 = vmatprep.subr.mxu1 %v2832_v30  ;;  %v2835_v32 = vmul.f32 %v952_v29, %v950_v31  ;;  %v1471_v29 = vld [vmem:[%s2956_s8 + $0x68] sm:$0xff]  ;;  %v1469_v31 = vld [vmem:[%s2956_s8 + $0x58] sm:$0xff] }
 0x3c9   : > { %2149 = vmatpush3.msra.mxu1 %v2832_v30 }
 0x3ca   : > { %2143 = vmatprep.mubr.f32.mxu0 %v2835_v32  ;;  %2150 = vmatprep.subr.mxu1 %v2835_v32 }
 0x3cb   : > { %2144 = vmatmul.mubr.f32.vlgmr.msra.gmra.mxu0 %v2832_v30  ;;  %2151 = vmatpush3.msra.mxu1 %v2835_v32 }
 0x3cc   : > { %2204 = vmatpush3.msra.mxu0 %v2457_v4  ;;  %v959_v4 = vld [vmem:[%s3028_s3 + $0x98] sm:$0xff]  ;;  %2213 = vmatprep.mubr.msk.f32.mxu0 %vm532_vm0, %v1206_v62 }
 0x48b   : > { %v2145_v25 = vpop.f32.mrf.mxu0 }
 0x48c   : > { %2152 = vmatprep.subr.mxu1 %v2145_v25 }
 0x48d   : > { %v1030_v33 = vpop.f32.mrf.mxu0  ;;  %2153 = vmatpush3.msra.mxu1 %v2145_v25  ;;  %v1466_v25 = vld [vmem:[%s2956_s8 + $0x40] sm:$0xff] }
 0x48e   : > { %2154 = vmatprep.subr.mxu1 %v1030_v33 }
 0x48f   : > { %2155 = vmatpush3.msra.mxu1 %v1030_v33  ;;  %v1465_v33 = vld [vmem:[%s2956_s8 + $0x38] sm:$0xff] }
 0x490   : > { %2157 = vmatmul.mubr.msk.f32.vlgmr.msra.gmra.mxu1 %vm532_vm0, %v957_v34  ;;  %2168 = vmatprep.subr.mxu1 %v2599_v7  ;;  %v1464_v34 = vld [vmem:[%s2956_s8 + $0x30] sm:$0xff] }
 0x491   : > { %2159 = vmatprep.mubr.msk.f32.mxu1 %vm532_vm0, %v958_v35  ;;  %2169 = vmatpush3.msra.mxu1 %v2599_v7  ;;  %v962_v7 = vld [vmem:[%s3028_s3 + $0xb0] sm:$0xff]  ;;  %v1463_v35 = vld [vmem:[%s2956_s8 + $0x28] sm:$0xff] }
 0x492   : > { %2170 = vmatprep.subr.mxu1 %v2602_v8 }
 0x493   : > { %2171 = vmatpush3.msra.mxu1 %v2602_v8  ;;  %v963_v8 = vld [vmem:[%s3028_s3 + $0xb8] sm:$0xff] }
 0x494   : > { %2160 = vmatmul.mubr.msk.f32.gmra.mxu1 %vm532_vm0, %v959_v4  ;;  %2172 = vmatprep.subr.mxu1 %v2609_v9  ;;  %v1462_v4 = vld [vmem:[%s2956_s8 + $0x20] sm:$0xff] }
 0x495   : > { %2162 = vmatprep.mubr.msk.f32.mxu1 %vm532_vm0, %v960_v36  ;;  %2173 = vmatpush3.msra.mxu1 %v2609_v9  ;;  %v1461_v36 = vld [vmem:[%s2956_s8 + $0x18] sm:$0xff] }
 0x496   : > { %2174 = vmatprep.subr.mxu1 %v2616_v10 }
 0x497   : > { %2175 = vmatpush3.msra.mxu1 %v2616_v10 }
 0x498   : > { %2163 = vmatmul.mubr.msk.f32.gmra.mxu1 %vm532_vm0, %v961_v37  ;;  %2176 = vmatprep.subr.mxu1 %v2621_v11  ;;  %v1460_v37 = vld [vmem:[%s2956_s8 + $0x10] sm:$0xff] }
 0x499   : > { %2165 = vmatprep.mubr.msk.f32.mxu1 %vm532_vm0, %v962_v7  ;;  %2177 = vmatpush3.msra.mxu1 %v2621_v11  ;;  %v1459_v7 = vld [vmem:[%s2956_s8 + $0x8] sm:$0xff] }
 0x49a   : > { %2178 = vmatprep.subr.mxu1 %v2626_v12 }
 0x49b   : > { %2179 = vmatpush3.msra.mxu1 %v2626_v12 }
 0x49c   : > { %2166 = vmatmul.mubr.msk.f32.gmra.mxu1 %vm532_vm0, %v963_v8  ;;  %2180 = vmatprep.subr.mxu1 %v2631_v13  ;;  %v1458_v8 = vld [vmem:[%s2956_s8] sm:$0xff] }
 0x49d   : > { %2181 = vmatpush3.msra.mxu1 %v2631_v13 }
 0x49e   : > { %2182 = vmatprep.subr.mxu1 %v2636_v14 }
 0x49f   : > { %2183 = vmatpush3.msra.mxu1 %v2636_v14 }
 0x4a0   : > { %2184 = vmatprep.subr.mxu1 %v2641_v15 }
 0x4a1   : > { %2185 = vmatpush3.msra.mxu1 %v2641_v15 }
 0x4a2   : > { %2186 = vmatprep.subr.mxu1 %v2646_v16 }
 0x4a3   : > { %2187 = vmatpush3.msra.mxu1 %v2646_v16 }
 0x4a4   : > { %2188 = vmatprep.subr.mxu1 %v2651_v17 }
 0x4a5   : > { %2189 = vmatpush3.msra.mxu1 %v2651_v17 }
 0x4a6   : > { %2190 = vmatprep.subr.mxu1 %v2656_v18 }
 0x4a7   : > { %2191 = vmatpush3.msra.mxu1 %v2656_v18 }
 0x4a8   : > { %2192 = vmatprep.subr.mxu1 %v2661_v19 }
 0x4a9   : > { %2193 = vmatpush3.msra.mxu1 %v2661_v19 }
 0x4aa   : > { %2194 = vmatprep.subr.mxu1 %v2666_v20 }
 0x4ab   : > { %2195 = vmatpush3.msra.mxu1 %v2666_v20 }
 0x4ac   : > { %2196 = vmatprep.subr.mxu1 %v2671_v21 }
 0x4ad   : > { %2197 = vmatpush3.msra.mxu1 %v2671_v21 }
 0x4ae   : > { %2198 = vmatprep.subr.mxu1 %v2676_v22 }
 0x4af   : > { %2199 = vmatpush3.msra.mxu1 %v2676_v22 }
 0x550   : > { %v2158_v9 = vpop.f32.mrf.mxu1 }
 0x551   : > { %v1831_v10 = vmul.f32 -1.442695, %v2158_v9 }
 0x552   : > { %v1129_v11 = vpop.f32.mrf.mxu1 }
 0x553   : > { %2355 = vpow2.f32 %v1831_v10  ;;  %v1830_v12 = vmul.f32 -1.442695, %v1129_v11 }
 0x554   : > { %v2161_v13 = vpop.f32.mrf.mxu1 }
 0x555   : > { %2357 = vpow2.f32 %v1830_v12  ;;  %v1833_v14 = vmul.f32 -1.442695, %v2161_v13 }
 0x556   : > { %v1139_v15 = vpop.f32.mrf.mxu1 }
 0x557   : > { %v1832_v16 = vmul.f32 -1.442695, %v1139_v15  ;;  %2359 = vpow2.f32 %v1833_v14 }
 0x558   : > { %v2164_v21 = vpop.f32.mrf.mxu1 }
 0x559   : > { %2361 = vpow2.f32 %v1832_v16 }
 0x55a   : > { %v1149_v38 = vpop.f32.mrf.mxu1 }
 0x55c   : > { %v2167_v41 = vpop.f32.mrf.mxu1 }
 0x55e   : > { %v1159_v46 = vpop.f32.mrf.mxu1 }
 0x560   : > { %v2356_v17 = vpop.eup %2355 }
 0x561   : > { %v1175_v18 = vadd.f32 1.0, %v2356_v17 }
 0x562   : > { %v2358_v19 = vpop.eup %2357 }
 0x563   : > { %2363 = vrcp.f32 %v1175_v18  ;;  %v1174_v20 = vadd.f32 1.0, %v2358_v19 }
 0x564   : > { %v2360_v22 = vpop.eup %2359 }
 0x565   : > { %2365 = vrcp.f32 %v1174_v20  ;;  %v1187_v40 = vadd.f32 1.0, %v2360_v22 }
 0x566   : > { %v2362_v39 = vpop.eup %2361 }
 0x567   : > { %v1186_v43 = vadd.f32 1.0, %v2362_v39  ;;  %2367 = vrcp.f32 %v1187_v40 }
 0x569   : > { %2369 = vrcp.f32 %v1186_v43 }
 0x570   : > { %v2364_v42 = vpop.eup %2363 }
 0x571   : > { %v1193_v44 = vmul.f32 %v2364_v42, %v2167_v41 }
 0x572   : > { %v2366_v45 = vpop.eup %2365 }
 0x573   : > { %v1195_v47 = vadd.f32 %v2164_v21, %v1193_v44  ;;  %v1192_v48 = vmul.f32 %v2366_v45, %v1159_v46 }
 0x574   : > { %v2368_v50 = vpop.eup %2367 }
 0x575   : > { %2371 = vtanh.f32 %v1195_v47  ;;  %v1194_v49 = vadd.f32 %v1192_v48, %v1149_v38  ;;  %v1199_v51 = vsub.f32 1.0, %v2368_v50  ;;  %v1203_v55 = vmul.f32 %v2368_v50, %v2832_v30  ;;  %v1470_v30 = vld [vmem:[%s2956_s8 + $0x60] sm:$0xff] }
 0x576   : > { %v2370_v52 = vpop.eup %2369 }
 0x577   : > { %2373 = vtanh.f32 %v1194_v49  ;;  %v1198_v56 = vsub.f32 1.0, %v2370_v52  ;;  %v1202_v60 = vmul.f32 %v2370_v52, %v2835_v32  ;;  %v1468_v32 = vld [vmem:[%s2956_s8 + $0x50] sm:$0xff]  ;;  %s1668_s8 = sshll.u32 %s416_s15, 4  ;;  %s1669_s8 = int_to_ptr.vmem [resolvable:$true] %s1668_s8 }
 0x578   : > { %s2395_s19 = scalar_lea.vmem %s1669_s8, 16  ;;  %p2402_p3 = scmp.lt.s32.totalorder %s1669_s8, %s2400_s21 }
 0x579   : > { %p2396_p0 = scmp.ne.s32.totalorder %s1669_s8, %s2395_s19  ;;  %p2403_p4 = scmp.lt.s32.totalorder %s2401_s28, %s2395_s19 }
 0x57b   : > { %p2397_p1 = pnand %p2396_p0, %p2546_p6  ;;  %p2404_p5 = por %p2403_p4, %p2402_p3 }
 0x57d   : > { %p2398_p2 = pneg %p2397_p1 }
 0x57f   : > { %p2405_p7 = pnand %p2404_p5, %p2398_p2 }
 0x582   : > { %v2372_v53 = vpop.eup %2371 }
 0x583   : > { %v1201_v54 = vmul.f32 %v2372_v53, %v1199_v51 }
 0x584   : > { %v2374_v57 = vpop.eup %2373 }
 0x585   : > { %v2908_v58 = vadd.f32 %v1203_v55, %v1201_v54  ;;  %v1200_v59 = vmul.f32 %v2374_v57, %v1198_v56 }
 0x587   : > { %2205 = vmatprep.subr.mxu0 %v2908_v58  ;;  %v2912_v61 = vadd.f32 %v1202_v60, %v1200_v59 }
 0x588   : > { %2206 = vmatpush3.msra.mxu0 %v2908_v58 }
 0x589   : > { %2200 = vmatprep.mubr.f32.mxu1 %v2912_v61  ;;  %2207 = vmatprep.subr.mxu0 %v2912_v61 }
 0x58a   : > { %2201 = vmatmul.mubr.f32.vlgmr.msra.gmra.mxu1 %v2908_v58  ;;  %2208 = vmatpush3.msra.mxu0 %v2912_v61 }
 0x64a   : > { %v2202_v63 = vpop.f32.mrf.mxu1 }
 0x64b   : > { %2209 = vmatprep.subr.mxu0 %v2202_v63 }
 0x64c   : > { %v1280_v0 = vpop.f32.mrf.mxu1  ;;  %2210 = vmatpush3.msra.mxu0 %v2202_v63 }
 0x64d   : > { %2211 = vmatprep.subr.mxu0 %v1280_v0 }
 0x64e   : > { %2212 = vmatpush3.msra.mxu0 %v1280_v0 }
 0x64f   : > { %2214 = vmatmul.mubr.msk.f32.vlgmr.msra.gmra.mxu0 %vm532_vm0, %v1207_v1  ;;  %2225 = vmatprep.subr.mxu0 %v1473_v27 }
 0x650   : > { %2216 = vmatprep.mubr.msk.f32.mxu0 %vm532_vm0, %v1208_v2  ;;  %2226 = vmatpush3.msra.mxu0 %v1473_v27  ;;  %v2458_v2 = vmov 0.0  }
 0x651   : > { %2227 = vmatprep.subr.mxu0 %v1472_v28  ;;  %2260 = vmatprep.subr.mxu1 %v2458_v2 }
 0x652   : > { %2228 = vmatpush3.msra.mxu0 %v1472_v28  ;;  %2264 = vmatprep.mubr.msk.f32.mxu1 %vm2459_vm1, %v2458_v2 }
 0x653   : > { %2217 = vmatmul.mubr.msk.f32.gmra.mxu0 %vm532_vm0, %v1209_v3  ;;  %2229 = vmatprep.subr.mxu0 %v1471_v29  ;;  %v1550_v3 = vld [vmem:[%s3029_s4 + $0x8] sm:$0xff] }
 0x654   : > { %2219 = vmatprep.mubr.msk.f32.mxu0 %vm532_vm0, %v1210_v23  ;;  %2230 = vmatpush3.msra.mxu0 %v1471_v29  ;;  %v2460_v23 = vmov 0  }
 0x655   : > { %2231 = vmatprep.subr.mxu0 %v1470_v30  ;;  %2311 = vset.pattern.permute.xlu0 %v2460_v23 }
 0x656   : > { %2232 = vmatpush3.msra.mxu0 %v1470_v30  ;;  %2313 = vset.pattern.permute.xlu1 %v2460_v23 }
 0x657   : > { %2220 = vmatmul.mubr.msk.f32.gmra.mxu0 %vm532_vm0, %v1211_v5  ;;  %2233 = vmatprep.subr.mxu0 %v1469_v31 }
 0x658   : > { %2222 = vmatprep.mubr.msk.f32.mxu0 %vm532_vm0, %v1212_v6  ;;  %2234 = vmatpush3.msra.mxu0 %v1469_v31  ;;  %v1549_v6 = vld [vmem:[%s3029_s4] sm:$0xff] }
 0x659   : > { %2235 = vmatprep.subr.mxu0 %v1468_v32  ;;  %1553 = vperm.xlu0 %2311, %v1550_v3   ;;  %v1631_v31 = vld [vmem:[%s430_s29] sm:$0xff] }
 0x65a   : > { %2236 = vmatpush3.msra.mxu0 %v1468_v32 }
 0x65b   : > { %2223 = vmatmul.mubr.msk.f32.gmra.mxu0 %vm532_vm0, %v1213_v26  ;;  %2237 = vmatprep.subr.mxu0 %v1467_v24 }
 0x65c   : > { %2238 = vmatpush3.msra.mxu0 %v1467_v24 }
 0x65d   : > { %2239 = vmatprep.subr.mxu0 %v1466_v25 }
 0x65e   : > { %2240 = vmatpush3.msra.mxu0 %v1466_v25 }
 0x65f   : > { %2241 = vmatprep.subr.mxu0 %v1465_v33 }
 0x660   : > { %2242 = vmatpush3.msra.mxu0 %v1465_v33 }
 0x661   : > { %2243 = vmatprep.subr.mxu0 %v1464_v34 }
 0x662   : > { %2244 = vmatpush3.msra.mxu0 %v1464_v34 }
 0x663   : > { %2245 = vmatprep.subr.mxu0 %v1463_v35 }
 0x664   : > { %2246 = vmatpush3.msra.mxu0 %v1463_v35 }
 0x665   : > { %2247 = vmatprep.subr.mxu0 %v1462_v4 }
 0x666   : > { %2248 = vmatpush3.msra.mxu0 %v1462_v4 }
 0x667   : > { %2249 = vmatprep.subr.mxu0 %v1461_v36 }
 0x668   : > { %2250 = vmatpush3.msra.mxu0 %v1461_v36 }
 0x669   : > { %2251 = vmatprep.subr.mxu0 %v1460_v37 }
 0x66a   : > { %2252 = vmatpush3.msra.mxu0 %v1460_v37 }
 0x66b   : > { %2253 = vmatprep.subr.mxu0 %v1459_v7 }
 0x66c   : > { %2254 = vmatpush3.msra.mxu0 %v1459_v7 }
 0x66d   : > { %2255 = vmatprep.subr.mxu0 %v1458_v8 }
 0x66e   : > { %2256 = vmatpush3.msra.mxu0 %v1458_v8 }
 0x6d4   : > { %v1554_v27 = vpop.permute.xlu0 %1553 }
 0x70f   : > { %v2215_v9 = vpop.f32.mrf.mxu0 }
 0x710   : > { %v1843_v10 = vmul.f32 -1.442695, %v2215_v9 }
 0x711   : > { %v1379_v11 = vpop.f32.mrf.mxu0 }
 0x712   : > { %2375 = vpow2.f32 %v1843_v10  ;;  %v1842_v12 = vmul.f32 -1.442695, %v1379_v11 }
 0x713   : > { %v2218_v13 = vpop.f32.mrf.mxu0 }
 0x714   : > { %2377 = vpow2.f32 %v1842_v12  ;;  %v1845_v14 = vmul.f32 -1.442695, %v2218_v13 }
 0x715   : > { %v1389_v15 = vpop.f32.mrf.mxu0 }
 0x716   : > { %v1844_v16 = vmul.f32 -1.442695, %v1389_v15  ;;  %2379 = vpow2.f32 %v1845_v14 }
 0x717   : > { %v2221_v21 = vpop.f32.mrf.mxu0 }
 0x718   : > { %2381 = vpow2.f32 %v1844_v16 }
 0x719   : > { %v1399_v38 = vpop.f32.mrf.mxu0 }
 0x71b   : > { %v2224_v41 = vpop.f32.mrf.mxu0 }
 0x71d   : > { %v1409_v46 = vpop.f32.mrf.mxu0 }
 0x71f   : > { %v2376_v17 = vpop.eup %2375 }
 0x720   : > { %v1425_v18 = vadd.f32 1.0, %v2376_v17 }
 0x721   : > { %v2378_v19 = vpop.eup %2377 }
 0x722   : > { %2383 = vrcp.f32 %v1425_v18  ;;  %v1424_v20 = vadd.f32 1.0, %v2378_v19 }
 0x723   : > { %v2380_v22 = vpop.eup %2379 }
 0x724   : > { %2385 = vrcp.f32 %v1424_v20  ;;  %v1437_v40 = vadd.f32 1.0, %v2380_v22 }
 0x725   : > { %v2382_v39 = vpop.eup %2381 }
 0x726   : > { %v1436_v43 = vadd.f32 1.0, %v2382_v39  ;;  %2387 = vrcp.f32 %v1437_v40 }
 0x728   : > { %2389 = vrcp.f32 %v1436_v43 }
 0x72f   : > { %v2384_v42 = vpop.eup %2383 }
 0x730   : > { %v1443_v44 = vmul.f32 %v2384_v42, %v2224_v41 }
 0x731   : > { %v2386_v45 = vpop.eup %2385 }
 0x732   : > { %v1445_v47 = vadd.f32 %v2221_v21, %v1443_v44  ;;  %v1442_v48 = vmul.f32 %v2386_v45, %v1409_v46 }
 0x733   : > { %v2388_v50 = vpop.eup %2387 }
 0x734   : > { %2391 = vtanh.f32 %v1445_v47  ;;  %v1444_v49 = vadd.f32 %v1442_v48, %v1399_v38  ;;  %v1449_v51 = vsub.f32 1.0, %v2388_v50  ;;  %v1453_v57 = vmul.f32 %v2388_v50, %v2908_v58  ;;  %v1633_v58 = vld [vmem:[%s3029_s4 + $0x10] sm:$0x1] }
 0x735   : > { %v2390_v52 = vpop.eup %2389  ;;  %1649 = vperm.xlu1 %2313, %v1633_v58  }
 0x736   : > { %2393 = vtanh.f32 %v1444_v49  ;;  %v1448_v54 = vsub.f32 1.0, %v2390_v52  ;;  %v1452_v60 = vmul.f32 %v2390_v52, %v2912_v61  ;;  %v2461_v61 = vmov 1  }
 0x737   : > { %2312 = vset.pattern.permute.xlu0 %v2461_v61 }
 0x738   : > { %1635 = vperm.xlu0 %2312, %v1550_v3  }
 0x73c   : > { %2314 = vset.pattern.permute.xlu0 %v2460_v23 }
 0x741   : > { %v2392_v53 = vpop.eup %2391 }
 0x742   : > { %v1451_v55 = vmul.f32 %v2392_v53, %v1449_v51 }
 0x743   : > { %v2394_v56 = vpop.eup %2393 }
 0x744   : > { %v1450_v59 = vmul.f32 %v2394_v56, %v1448_v54  ;;  %v1455_v62 = vadd.f32 %v1453_v57, %v1451_v55 }
 0x746   : > { %v1454_v63 = vadd.f32 %v1452_v60, %v1450_v59  ;;  %v1457_v1 = vmax.f32 %v1455_v62, 0.0 }
 0x748   : > { %v1456_v0 = vmax.f32 %v1454_v63, 0.0 }
 0x74a   : > { %2257 = vmatprep.mubr.f32.mxu0 %v1456_v0 }
 0x74b   : > { %2258 = vmatmul.mubr.f32.vlgmr.msra.gmra.mxu0 %v1457_v1 }
 0x7b0   : > { %v1650_v8 = vpop.permute.xlu1 %1649 }
 0x7b3   : > { %v1636_v24 = vpop.permute.xlu0 %1635 }
 0x80b   : > { %v2259_v5 = vpop.f32.mrf.mxu0 }
 0x80c   : > { %2261 = vmatpush3.msra.mxu1 %v2259_v5 }
 0x80d   : > { %v1540_v26 = vpop.f32.mrf.mxu0  ;;  %2262 = vmatprep.subr.mxu1 %v2458_v2 }
 0x80e   : > { %2263 = vmatpush3.msra.mxu1 %v1540_v26 }
 0x80f   : > { %2265 = vmatmul.mubr.msk.f32.vlgmr.msra.gmra.mxu1 %vm1556_vm2, %v1549_v6 }
 0x8cf   : > { %v1626_v28 = vpop.f32.mrf.mxu1 }
 0x8d0   : > { %v1627_v29 = vadd.f32 %v1626_v28, %v1554_v27 }
 0x8d1   : > { %v2266_v30 = vpop.f32.mrf.mxu1 }
 0x8d2   : > { %v1630_v32 = vmax.f32 %v1627_v29, 0.0 }
 0x8d4   : > { %v1632_v25 = vmul.f32 %v1631_v31, %v1630_v32 }
 0x8d6   : > { %v1638_v33 = vmul.f32 %v1636_v24, %v1632_v25 }
 0x8d8   : > { %v1640_v34 = vsel %vm1639_vm3, %v1638_v33, 0.0 }
 0x8d9   : > { %v1641_v35 = vrot.slane %v1640_v34, 4 }
 0x8db   : > { %v1642_v4 = vadd.f32 %v1641_v35, %v1640_v34 }
 0x8dd   : > { %v1643_v36 = vrot.slane %v1642_v4, 2 }
 0x8df   : > { %v1644_v37 = vadd.f32 %v1643_v36, %v1642_v4 }
 0x8e1   : > { %v1645_v7 = vrot.slane %v1644_v37, 1 }
 0x8e3   : > { %v1646_v9 = vadd.f32 %v1645_v7, %v1644_v37 }
 0x8e5   : > { %v1652_v10 = vadd.f32 %v1650_v8, %v1646_v9 }
 0x8e7   : > { %1654 = vst.msk [vmem:[%s416_s15] sm:$0x1] %vm1653_vm4, %v1652_v10 }
 0x8e8   : > { %2408 = shalt.err (!%p2405_p7)
}
 0x8e9   : > { %s2409_s22 = scalar_lea.hbm %s1666_s14, 16  ;;  %s2413_s29 = scalar_lea.hbm %s3032_s7, 32 }
 0x8ea   : > { %p2410_p10 = scmp.ne.s32.totalorder %s1666_s14, %s2409_s22  ;;  %p2414_p13 = scmp.lt.s32.totalorder %s1666_s14, %s3032_s7 }
 0x8eb   : > { %p2415_p0 = scmp.lt.s32.totalorder %s2413_s29, %s2409_s22 }
 0x8ec   : > { %p2411_p11 = pnand %p2410_p10, %p2546_p6 }
 0x8ed   : > { %p2416_p1 = por %p2415_p0, %p2414_p13 }
 0x8ee   : > { %p2412_p12 = pneg %p2411_p11 }
 0x8f0   : > { %p2417_p9 = pnand %p2416_p1, %p2412_p12 }
 0x8f2   : > { %2420 = shalt.err (!%p2417_p9)
}
 0x8f3   : > { %2267 = dma.vmem_to_hbm [thread:$0]  (%p2546_p6), %s1669_s8, 16, %s1666_s14, %s1656_s18  }
 0x8f4 PF: > { %s1680_s17 = sand.u32 1, %s2443_s24   ;;  %p3037_p2 = scmp.ge.s32.totalorder %s2455_s27, 2 }
 0x8f5   : > { %s1681_s9 = scalar_lea.sflag [#allocation5], %s1680_s17 }
 0x8f6   : > { %p2270_p3 = pnand %p3037_p2, %p2550_p8 }
 0x8f8   : > { %p2271_p4 = pneg %p2270_p3 }
 0x8fa   : > { %2438 = dma.done.wait (%p2271_p4), %s1681_s9, 16  }
 0x8fb   : > { %2440 = vsyncadd (%p2271_p4), %s1681_s9, 4294967280  ;;  %p17_p9 = scmp.ge.s32.totalorder %s2528_s30, 4   ;;  %s3038_s24 = smov %s2447_s25 }
 0x8fc   : > { %s3039_s25 = smov %s2451_s26  ;;  %s3040_s26 = smov %s2540_s10 }
 0x8fd   : > { %s3041_s27 = smov %s2528_s30  ;;  %19 = sbr.rel (!%p17_p9) target bundleno = 3 (0x3), region = 181 }
 0x902   :  { %1685 = vsyncpa [#allocation5], 1 }
 0x903   :  { %1687 = vsyncpa [#allocation5 + $0x1], 1 }

</bundles_post_ra>
